<compile_context>
chip_gen: v7x
topology: tpu7x:2x2x1
jax: 0.10.0
libtpu: 0.0.40
codegen_flags: <defaults>
</compile_context>

<pallas_src>
import functools

import jax
import jax.numpy as jnp
from jax.experimental import pallas as pl
from jax.experimental.pallas import tpu as pltpu


# ---------------------------------------------------------------------------
# Kernel
# ---------------------------------------------------------------------------
def triple_loss_kernel(a_ref, p_ref, n_ref, o_ref, acc_ref, *,
                       margin, inv_n, n_rows, tile_n):
  """Fused triplet hinge loss over one (tile_n, D) row-tile.

  a_ref/p_ref/n_ref: (tile_n, D) f32 VMEM tiles.
  o_ref:   (1, 1) f32 SMEM output (written on the last grid step).
  acc_ref: (1, 1) f32 SMEM scratch accumulator (persists across grid steps).
  """
  i = pl.program_id(0)

  @pl.when(i == 0)
  def _():
    acc_ref[0, 0] = 0.0

  a = a_ref[...]
  p = p_ref[...]
  n = n_ref[...]

  dp = a - p
  dn = a - n

  # ||.||_2 along dim=1: lane reduce (XLU) -> (tile_n, 1), sqrt on EUP.
  pos_d = jnp.sqrt(jnp.sum(dp * dp, axis=1, keepdims=True))
  neg_d = jnp.sqrt(jnp.sum(dn * dn, axis=1, keepdims=True))

  hinge = jnp.maximum(pos_d - neg_d + margin, 0.0)     # relu(pos - neg + m)

  # Mask rows that fall past the true batch size (padded last tile).
  row = i * tile_n + jax.lax.broadcasted_iota(jnp.int32, hinge.shape, 0)
  hinge = jnp.where(row < n_rows, hinge, 0.0)

  acc_ref[0, 0] += jnp.sum(hinge)

  @pl.when(i == pl.num_programs(0) - 1)
  def _():
    o_ref[0, 0] = acc_ref[0, 0] * inv_n                # mean over batch


# ---------------------------------------------------------------------------
# Wrapper
# ---------------------------------------------------------------------------
def triple_loss(anchor, positive, negative, margin=0.1):
  """anchor/positive/negative: (N, D) arrays -> scalar f32 loss."""
  N, D = anchor.shape

  # Whole batch in one step when it is small; otherwise tile rows (multiple
  # of 8 sublanes) and let the auto-pipeliner double-buffer the HBM->VMEM DMA.
  tile_n = N if N <= 1024 else 1024
  grid = (pl.cdiv(N, tile_n),)

  kernel = functools.partial(
      triple_loss_kernel,
      margin=float(margin),
      inv_n=1.0 / float(N),
      n_rows=N,
      tile_n=tile_n,
  )

  row_spec = pl.BlockSpec((tile_n, D), lambda i: (i, 0))

  out = pl.pallas_call(
      kernel,
      grid=grid,
      in_specs=[row_spec, row_spec, row_spec],
      out_specs=pl.BlockSpec(memory_space=pltpu.MemorySpace.SMEM),
      out_shape=jax.ShapeDtypeStruct((1, 1), jnp.float32),
      scratch_shapes=[pltpu.SMEM((1, 1), jnp.float32)],
      compiler_params=pltpu.CompilerParams(
          dimension_semantics=("arbitrary",)),   # grid axis is a reduction
  )(anchor.astype(jnp.float32),
    positive.astype(jnp.float32),
    negative.astype(jnp.float32))
  return out[0, 0]


# ---------------------------------------------------------------------------
# Pure-JAX reference (correctness check)
# ---------------------------------------------------------------------------
def ref_triple_loss(anchor, positive, negative, margin=0.1):
  pos_d = jnp.sqrt(jnp.sum((anchor - positive) ** 2, axis=1))
  neg_d = jnp.sqrt(jnp.sum((anchor - negative) ** 2, axis=1))
  return jnp.mean(jnp.maximum(pos_d - neg_d + margin, 0.0))


# ---------------------------------------------------------------------------
if __name__ == "__main__":
  N, D = 8, 128          # small, lane-dense demo shapes
  margin = 0.1

  key = jax.random.PRNGKey(0)
  ka, kp, kn = jax.random.split(key, 3)
  anchor = jax.random.normal(ka, (N, D), jnp.float32)
  positive = anchor + 0.1 * jax.random.normal(kp, (N, D), jnp.float32)
  negative = jax.random.normal(kn, (N, D), jnp.float32)

  out = jax.block_until_ready(triple_loss(anchor, positive, negative, margin))
  ref = jax.block_until_ready(ref_triple_loss(anchor, positive, negative, margin))

  assert out.shape == (), f"expected scalar, got {out.shape}"
  assert jnp.allclose(out, ref, rtol=1e-5, atol=1e-5), \
      f"kernel={out} ref={ref} abs_err={jnp.abs(out - ref)}"

  print("KERNEL_OK")
</pallas_src>

<mosaic_0001>
module attributes {stable_mosaic.version = 11 : i64} {
  func.func @triple_loss_kernel(%arg0: i32, %arg1: memref<8x128xf32, #tpu.memory_space<vmem>>, %arg2: memref<8x128xf32, #tpu.memory_space<vmem>>, %arg3: memref<8x128xf32, #tpu.memory_space<vmem>>, %arg4: memref<1x1xf32, #tpu.memory_space<smem>>, %arg5: memref<1x1xf32, #tpu.memory_space<smem>>) attributes {dimension_semantics = [#tpu.dimension_semantics<arbitrary>], iteration_bounds = array<i64: 1>, scalar_prefetch = 0 : i64, scratch_operands = 1 : i64, tpu.core_type = #tpu.core_type<tc>, window_params = [{transform_indices = @transform_0, window_bounds = array<i64: 8, 128>}, {transform_indices = @transform_1, window_bounds = array<i64: 8, 128>}, {transform_indices = @transform_2, window_bounds = array<i64: 8, 128>}, {transform_indices = @transform_3, window_bounds = array<i64: 1, 1>}]} {
    %c0_i32 = arith.constant 0 : i32
    %0 = arith.cmpi eq, %arg0, %c0_i32 : i32
    %1 = arith.extui %0 : i1 to i32
    %c0_i32_0 = arith.constant 0 : i32
    %2 = arith.cmpi ne, %1, %c0_i32_0 : i32
    scf.if %2 {
      %cst_18 = arith.constant 0.000000e+00 : f32
      %c0_19 = arith.constant 0 : index
      %c0_20 = arith.constant 0 : index
      %39 = memref.load %arg5[%c0_19, %c0_20] : memref<1x1xf32, #tpu.memory_space<smem>>
      memref.store %cst_18, %arg5[%c0_19, %c0_20] : memref<1x1xf32, #tpu.memory_space<smem>>
    } else {
    }
    %c0 = arith.constant 0 : index
    %c0_1 = arith.constant 0 : index
    %3 = vector.load %arg1[%c0, %c0_1] : memref<8x128xf32, #tpu.memory_space<vmem>>, vector<8x128xf32>
    %c0_2 = arith.constant 0 : index
    %c0_3 = arith.constant 0 : index
    %4 = vector.load %arg2[%c0_2, %c0_3] : memref<8x128xf32, #tpu.memory_space<vmem>>, vector<8x128xf32>
    %c0_4 = arith.constant 0 : index
    %c0_5 = arith.constant 0 : index
    %5 = vector.load %arg3[%c0_4, %c0_5] : memref<8x128xf32, #tpu.memory_space<vmem>>, vector<8x128xf32>
    %6 = arith.subf %3, %4 : vector<8x128xf32>
    %7 = arith.subf %3, %5 : vector<8x128xf32>
    %8 = arith.mulf %6, %6 : vector<8x128xf32>
    %cst = arith.constant dense<0.000000e+00> : vector<8xf32>
    %9 = vector.multi_reduction <add>, %8, %cst [1] : vector<8x128xf32> to vector<8xf32>
    %10 = vector.shape_cast %9 : vector<8xf32> to vector<8x1xf32>
    %11 = math.sqrt %10 : vector<8x1xf32>
    %12 = arith.mulf %7, %7 : vector<8x128xf32>
    %cst_6 = arith.constant dense<0.000000e+00> : vector<8xf32>
    %13 = vector.multi_reduction <add>, %12, %cst_6 [1] : vector<8x128xf32> to vector<8xf32>
    %14 = vector.shape_cast %13 : vector<8xf32> to vector<8x1xf32>
    %15 = math.sqrt %14 : vector<8x1xf32>
    %16 = arith.subf %11, %15 : vector<8x1xf32>
    %cst_7 = arith.constant 1.000000e-01 : f32
    %17 = vector.broadcast %cst_7 : f32 to vector<8x1xf32>
    %18 = arith.addf %16, %17 : vector<8x1xf32>
    %cst_8 = arith.constant 0.000000e+00 : f32
    %19 = vector.broadcast %cst_8 : f32 to vector<8x1xf32>
    %20 = arith.maximumf %18, %19 : vector<8x1xf32>
    %c8_i32 = arith.constant 8 : i32
    %21 = arith.muli %arg0, %c8_i32 : i32
    %22 = tpu.iota {dimensions = array<i32: 0>} : vector<8x1xi32>
    %23 = vector.broadcast %21 : i32 to vector<8x1xi32>
    %24 = arith.addi %23, %22 : vector<8x1xi32>
    %c8_i32_9 = arith.constant 8 : i32
    %25 = vector.broadcast %c8_i32_9 : i32 to vector<8x1xi32>
    %26 = arith.cmpi slt, %24, %25 : vector<8x1xi32>
    %cst_10 = arith.constant 0.000000e+00 : f32
    %27 = vector.broadcast %cst_10 : f32 to vector<8x1xf32>
    %28 = arith.select %26, %20, %27 : vector<8x1xi1>, vector<8x1xf32>
    %c0_11 = arith.constant 0 : index
    %c0_12 = arith.constant 0 : index
    %29 = memref.load %arg5[%c0_11, %c0_12] : memref<1x1xf32, #tpu.memory_space<smem>>
    %30 = vector.shape_cast %28 : vector<8x1xf32> to vector<1x8x1xf32>
    %cst_13 = arith.constant dense<0.000000e+00> : vector<1xf32>
    %31 = vector.multi_reduction <add>, %30, %cst_13 [1, 2] : vector<1x8x1xf32> to vector<1xf32>
    %32 = vector.shape_cast %31 : vector<1xf32> to vector<1x1x1xf32>
    %33 = vector.extract %32[0, 0, 0] : f32 from vector<1x1x1xf32>
    %34 = arith.addf %29, %33 : f32
    %c0_14 = arith.constant 0 : index
    %c0_15 = arith.constant 0 : index
    %35 = memref.load %arg5[%c0_14, %c0_15] : memref<1x1xf32, #tpu.memory_space<smem>>
    memref.store %34, %arg5[%c0_14, %c0_15] : memref<1x1xf32, #tpu.memory_space<smem>>
    %c0_i32_16 = arith.constant 0 : i32
    %36 = arith.cmpi eq, %arg0, %c0_i32_16 : i32
    %37 = arith.extui %36 : i1 to i32
    %c0_i32_17 = arith.constant 0 : i32
    %38 = arith.cmpi ne, %37, %c0_i32_17 : i32
    scf.if %38 {
      %c0_18 = arith.constant 0 : index
      %c0_19 = arith.constant 0 : index
      %39 = memref.load %arg5[%c0_18, %c0_19] : memref<1x1xf32, #tpu.memory_space<smem>>
      %cst_20 = arith.constant 1.250000e-01 : f32
      %40 = arith.mulf %39, %cst_20 : f32
      %c0_21 = arith.constant 0 : index
      %c0_22 = arith.constant 0 : index
      %41 = memref.load %arg4[%c0_21, %c0_22] : memref<1x1xf32, #tpu.memory_space<smem>>
      memref.store %40, %arg4[%c0_21, %c0_22] : memref<1x1xf32, #tpu.memory_space<smem>>
    } else {
    }
    return
  }
  func.func @transform_0(%arg0: i32) -> (i32, i32) {
    %c0_i32 = arith.constant 0 : i32
    %c0_i32_0 = arith.constant 0 : i32
    return %arg0, %c0_i32 : i32, i32
  }
  func.func @transform_1(%arg0: i32) -> (i32, i32) {
    %c0_i32 = arith.constant 0 : i32
    %c0_i32_0 = arith.constant 0 : i32
    return %arg0, %c0_i32 : i32, i32
  }
  func.func @transform_2(%arg0: i32) -> (i32, i32) {
    %c0_i32 = arith.constant 0 : i32
    %c0_i32_0 = arith.constant 0 : i32
    return %arg0, %c0_i32 : i32, i32
  }
  func.func @transform_3(%arg0: i32) -> (i32, i32) {
    %c0_i32 = arith.constant 0 : i32
    %c0_i32_0 = arith.constant 0 : i32
    %c0_i32_1 = arith.constant 0 : i32
    return %c0_i32, %c0_i32_0 : i32, i32
  }
}

</mosaic_0001>

<bundles_post_ra>
// kernel: tpu_custom_call.1
= control target key start
LH: loop header
LB: loop body
LE: loop exit
PB: predicated region body
PF: predicated region fallthrough
CT: control target
= control target key end

     0   :  { %8 = vsyncpa [#allocation4], 0  ;;  %s292_s0 = inlined_call_operand.hbm [shape: f32[8,128], index: 0, kind: input, shape index: {}]   ;;  %s293_s1 = inlined_call_operand.hbm [shape: f32[8,128], index: 1, kind: input, shape index: {}]   ;;  %s294_s2 = inlined_call_operand.hbm [shape: f32[8,128], index: 2, kind: input, shape index: {}]   ;;  %s295_s3 = inlined_call_operand.hbm [shape: f32[1,1], index: 3, kind: output, shape index: {}]  }
   0x1   :  { %9 = vsyncpa [#allocation7], 0 }
   0x2   :  { %10 = vsyncpa [#allocation5], 0  ;;  %s220_s12 = smov [#allocation6]   ;;  %s221_s14 = smov [#allocation3]  }
   0x3   :  { %s27_s13 = sshll.u32 %s220_s12, 4  ;;  %s17_s15 = sshll.u32 %s221_s14, 4  ;;  %s28_s13 = int_to_ptr.vmem [resolvable:$true] %s27_s13  ;;  %s18_s15 = int_to_ptr.vmem [resolvable:$true] %s17_s15 }
   0x4   :  { %s138_s18 = scalar_lea.hbm %s293_s1, 128 }
   0x5   :  { %p139_p0 = scmp.ne.s32.totalorder %s293_s1, %s138_s18  ;;  %p142_p1 = scmp.lt.u32.totalorder %s138_s18, %s293_s1 }
   0x7   :  { %p144_p2 = pnand %p142_p1, %p139_p0 }
   0x9   :  { %147 = shalt.err (!%p144_p2)
}
   0xa   :  { %s148_s23 = scalar_lea.vmem %s28_s13, 128  ;;  %p153_p4 = scmp.lt.s32.totalorder %s28_s13, %s28_s13 }
   0xb   :  { %p149_p3 = scmp.ne.s32.totalorder %s28_s13, %s148_s23  ;;  %p154_p5 = scmp.lt.s32.totalorder %s148_s23, %s148_s23 }
   0xd   :  { %p155_p6 = por %p154_p5, %p153_p4 }
   0xf   :  { %p156_p7 = pnand %p155_p6, %p149_p3 }
  0x11   :  { %159 = shalt.err (!%p156_p7)
}
  0x12   :  { %30 = dma.hbm_to_vmem [thread:$0]  %s293_s1, 128, %s28_s13, [#allocation7]  }
  0x13   :  { %s160_s28 = scalar_lea.hbm %s292_s0, 128 }
  0x14   :  { %p161_p8 = scmp.ne.s32.totalorder %s292_s0, %s160_s28  ;;  %p164_p9 = scmp.lt.u32.totalorder %s160_s28, %s292_s0 }
  0x16   :  { %p166_p10 = pnand %p164_p9, %p161_p8 }
  0x18   :  { %169 = shalt.err (!%p166_p10)
}
  0x19   :  { %s170_s6 = scalar_lea.vmem %s18_s15, 128  ;;  %p175_p12 = scmp.lt.s32.totalorder %s18_s15, %s18_s15 }
  0x1a   :  { %p171_p11 = scmp.ne.s32.totalorder %s18_s15, %s170_s6  ;;  %p176_p13 = scmp.lt.s32.totalorder %s170_s6, %s170_s6 }
  0x1c   :  { %p177_p0 = por %p176_p13, %p175_p12 }
  0x1e   :  { %p178_p1 = pnand %p177_p0, %p171_p11 }
  0x20   :  { %181 = shalt.err (!%p178_p1)
}
  0x21   :  { %20 = dma.hbm_to_vmem [thread:$0]  %s292_s0, 128, %s18_s15, [#allocation4]  }
  0x22   :  { %s222_s8 = smov [#allocation8]   ;;  %s182_s12 = scalar_lea.hbm %s294_s2, 128 }
  0x23   :  { %s37_s9 = sshll.u32 %s222_s8, 4  ;;  %p183_p2 = scmp.ne.s32.totalorder %s294_s2, %s182_s12  ;;  %s38_s9 = int_to_ptr.vmem [resolvable:$true] %s37_s9 }
  0x24   :  { %p186_p3 = scmp.lt.u32.totalorder %s182_s12, %s294_s2 }
  0x26   :  { %p188_p4 = pnand %p186_p3, %p183_p2 }
  0x28   :  { %191 = shalt.err (!%p188_p4)
}
  0x29   :  { %s192_s18 = scalar_lea.vmem %s38_s9, 128  ;;  %p197_p6 = scmp.lt.s32.totalorder %s38_s9, %s38_s9 }
  0x2a   :  { %p193_p5 = scmp.ne.s32.totalorder %s38_s9, %s192_s18  ;;  %p198_p7 = scmp.lt.s32.totalorder %s192_s18, %s192_s18 }
  0x2c   :  { %p199_p8 = por %p198_p7, %p197_p6 }
  0x2e   :  { %p200_p9 = pnand %p199_p8, %p193_p5 }
  0x30   :  { %203 = shalt.err (!%p200_p9)
}
  0x31   :  { %40 = dma.hbm_to_vmem [thread:$0]  %s294_s2, 128, %s38_s9, [#allocation7]  }
  0x32   :  { %214 = dma.done.wait [#allocation4], 128  }
  0x33   :  { %215 = vsyncadd [#allocation4], 4294967168 }
  0x34   :  { %216 = dma.done.wait [#allocation7], 256  }
  0x35   :  { %217 = vsyncadd [#allocation7], 4294967040  ;;  %v56_v0 = vld [vmem:[#allocation3] sm:$0xff]  ;;  %v57_v1 = vld [vmem:[#allocation6] sm:$0xff]  ;;  %vm92_vm4 = vcmask 7168   ;;  %s204_s22 = scalar_lea.hbm %s295_s3, 16 }
  0x36   :  { %v58_v2 = vld [vmem:[#allocation8] sm:$0xff]  ;;  %v59_v3 = vsub.f32 %v56_v0, %v57_v1  ;;  %p205_p10 = scmp.ne.s32.totalorder %s295_s3, %s204_s22  ;;  %p208_p11 = scmp.lt.u32.totalorder %s204_s22, %s295_s3 }
  0x37   :  { %v60_v4 = vsub.f32 %v56_v0, %v58_v2 }
  0x38   :  { %v61_v5 = vmul.f32 %v59_v3, %v59_v3  ;;  %p210_p12 = pnand %p208_p11, %p205_p10 }
  0x39   :  { %v71_v6 = vmul.f32 %v60_v4, %v60_v4 }
  0x3a   :  { %62 = vadd.xlane.f32.xlu0 %v61_v5 }
  0x3e   :  { %72 = vadd.xlane.f32.xlu0 %v71_v6 }
  0xc7   :  { %v63_v7 = vpop.xlane.xlu0 %62 }
  0xc8   :  { %134 = vrsqrt.f32 %v63_v7  ;;  %vm66_vm0 = vcmp.eq.f32.partialorder %v63_v7, inf  ;;  %v69_v14 = vand.u32 2147483648, %v63_v7  ;;  %vm68_vm2 = vcmp.eq.f32.partialorder %v63_v7, 0.0 }
  0xcb   :  { %v73_v8 = vpop.xlane.xlu0 %72 }
  0xcc   :  { %136 = vrsqrt.f32 %v73_v8  ;;  %vm76_vm1 = vcmp.eq.f32.partialorder %v73_v8, inf  ;;  %v79_v15 = vand.u32 2147483648, %v73_v8  ;;  %vm78_vm3 = vcmp.eq.f32.partialorder %v73_v8, 0.0 }
  0xd2   :  { %v135_v9 = vpop.eup %134 }
  0xd3   :  { %v65_v10 = vmul.f32 %v135_v9, %v63_v7 }
  0xd5   :  { %v67_v13 = vsel %vm66_vm0, %v63_v7, %v65_v10 }
  0xd6   :  { %v137_v11 = vpop.eup %136  ;;  %v70_v17 = vsel %vm68_vm2, %v69_v14, %v67_v13 }
  0xd7   :  { %v75_v12 = vmul.f32 %v137_v11, %v73_v8 }
  0xd9   :  { %v77_v16 = vsel %vm76_vm1, %v73_v8, %v75_v12 }
  0xda   :  { %v80_v18 = vsel %vm78_vm3, %v79_v15, %v77_v16 }
  0xdb   :  { %v81_v19 = vsub.f32 %v70_v17, %v80_v18 }
  0xdd   :  { %v82_v20 = vadd.f32 0.1, %v81_v19 }
  0xdf   :  { %v83_v21 = vmax.f32 %v82_v20, 0.0 }
  0xe1   :  { %v93_v22 = vsel %vm92_vm4, %v83_v21, 0.0 }
  0xe2   :  { %94 = vadd.xlane.f32.xlu1 %v93_v22 }
 0x16f   :  { %v95_v23 = vpop.xlane.xlu1 %94 }
 0x170   :  { %v96_v24 = vrot.slane %v95_v23, 4 }
 0x172   :  { %v97_v25 = vadd.f32 %v96_v24, %v95_v23 }
 0x174   :  { %v98_v26 = vrot.slane %v97_v25, 2 }
 0x176   :  { %v99_v27 = vadd.f32 %v98_v26, %v97_v25 }
 0x178   :  { %v100_v28 = vrot.slane %v99_v27, 1 }
 0x17a   :  { %v101_v29 = vadd.f32 %v100_v28, %v99_v27 }
 0x17c   :  { %128 = vpush %v101_v29 }
 0x1ad   :  { %s129_s2 = spop %128 }
 0x1ae   :  { %s110_s19 = smul.f32 0.125, %s129_s2 }
 0x1b0   :  { %112 = sst [smem:[#allocation9]] %s110_s19 }
 0x1b1   :  { %213 = shalt.err (!%p210_p12)
}
 0x1b2   :  { %s223_s27 = smov [#allocation9]  }
 0x1b3   :  { %120 = dma.smem_to_hbm %s223_s27, 16, %s295_s3, [#allocation5]  }
 0x1b4   :  { %218 = dma.done.wait [#allocation5], 16  }
 0x1b5   :  { %219 = vsyncadd [#allocation5], 4294967280 }
 0x1b6   :  { %124 = sfence }
 0x1b7   :  { %125 = vsyncpa [#allocation4], 1 }
 0x1b8   :  { %126 = vsyncpa [#allocation7], 1 }
 0x1b9   :  { %127 = vsyncpa [#allocation5], 1 }

</bundles_post_ra>
